<compile_context>
chip_gen: v6e
topology: v6e:2x2x1
jax: 0.10.0
libtpu: 0.0.40
codegen_flags: <defaults>
</compile_context>

<pallas_src>
import jax
import jax.numpy as jnp
from jax.experimental import pallas as pl
from jax.experimental.pallas import tpu as pltpu

_LANES = 128
_SUBLANES = 8


# ---------------------------------------------------------------------------
# Rank-1 . Rank-1 -> scalar  (the actual MatmulDot forward)
# ---------------------------------------------------------------------------
def _dot_kernel(lhs_ref, rhs_ref, out_ref):
    # lhs_ref / rhs_ref: (rows, 128) f32 lane-dense tiles in VMEM.
    # out_ref: (1, 1) f32 scalar slot in SMEM.
    out_ref[0, 0] = jnp.sum(lhs_ref[...] * rhs_ref[...])


def _dot1d(lhs: jax.Array, rhs: jax.Array) -> jax.Array:
    (k,) = lhs.shape
    assert rhs.shape == (k,), "dot product requires equal-length vectors"
    # Pad to a lane-dense (rows, 128) slab with rows a multiple of 8 so the
    # VPU works on full vregs; zero padding does not change the dot product.
    chunk = _SUBLANES * _LANES
    kp = pl.cdiv(k, chunk) * chunk
    lhs_p = jnp.zeros((kp,), jnp.float32).at[:k].set(lhs.astype(jnp.float32))
    rhs_p = jnp.zeros((kp,), jnp.float32).at[:k].set(rhs.astype(jnp.float32))
    lhs_p = lhs_p.reshape(-1, _LANES)
    rhs_p = rhs_p.reshape(-1, _LANES)

    # Single invocation (no grid): the problem is tiny, so per-grid-step
    # pipeline overhead would dominate any tiling.
    out = pl.pallas_call(
        _dot_kernel,
        out_shape=jax.ShapeDtypeStruct((1, 1), jnp.float32),
        in_specs=[
            pl.BlockSpec(memory_space=pltpu.MemorySpace.VMEM),
            pl.BlockSpec(memory_space=pltpu.MemorySpace.VMEM),
        ],
        out_specs=pl.BlockSpec(memory_space=pltpu.MemorySpace.SMEM),
        cost_estimate=pl.CostEstimate(
            flops=2 * k, transcendentals=0, bytes_accessed=8 * k + 4
        ),
    )(lhs_p, rhs_p)
    return out[0, 0].astype(lhs.dtype)


# ---------------------------------------------------------------------------
# Broadcast-batched matmul:  lhs [A,B,M,K] x rhs [B,K,N] -> [A,B,M,N]
# ---------------------------------------------------------------------------
def _bmm_kernel(lhs_ref, rhs_ref, out_ref, acc_ref):
    # Batch block dim is squeezed: lhs_ref (tm, tk), rhs_ref (tk, tn),
    # out_ref (tm, tn), acc_ref (tm, tn) f32 scratch.
    @pl.when(pl.program_id(3) == 0)
    def _init():
        acc_ref[...] = jnp.zeros_like(acc_ref)

    acc_ref[...] += jnp.dot(
        lhs_ref[...], rhs_ref[...], preferred_element_type=jnp.float32
    )

    @pl.when(pl.program_id(3) == pl.num_programs(3) - 1)
    def _writeback():
        out_ref[...] = acc_ref[...].astype(out_ref.dtype)


def _pick_tile(dim: int, target: int, align: int) -> int:
    """Largest `align`-aligned divisor of `dim` that is <= target.

    Returns the full dim when it already fits (a block equal to the full
    array dim is always layout-legal) or when no aligned divisor exists.
    """
    if dim <= target:
        return dim
    t = (target // align) * align
    while t > align and dim % t:
        t -= align
    if t >= align and dim % t == 0:
        return t
    return dim  # fall back to the full dimension


def _matmul_broadcast_batch_dim(lhs: jax.Array, rhs: jax.Array) -> jax.Array:
    """torch.matmul(lhs[A,B,M,K], rhs[B,K,N]) -> [A,B,M,N] (rhs broadcast over A)."""
    A, B, M, K = lhs.shape
    Br, Kr, N = rhs.shape
    assert Br == B and Kr == K, "shape mismatch for broadcast matmul"

    # Fold A into M so one rhs tile (one MXU weight push) serves A*M rows.
    AM = A * M
    lhs_f = jnp.transpose(lhs, (1, 0, 2, 3)).reshape(B, AM, K)

    # Tile targets sized conservatively so the double-buffered working set
    # (~3 MiB at 256/256/512 f32) fits the default scoped VMEM on v5e/v6e/v7x.
    # m-tile needs 8-alignment (sublane dim); k/n tiles need 128-alignment
    # (lane dims) unless they equal the full dim.
    tm = _pick_tile(AM, 256, _SUBLANES)
    tn = _pick_tile(N, 256, _LANES)
    tk = _pick_tile(K, 512, _LANES)

    grid = (B, pl.cdiv(AM, tm), pl.cdiv(N, tn), pl.cdiv(K, tk))

    out_f = pl.pallas_call(
        _bmm_kernel,
        out_shape=jax.ShapeDtypeStruct((B, AM, N), lhs.dtype),
        grid_spec=pltpu.PrefetchScalarGridSpec(
            num_scalar_prefetch=0,
            grid=grid,
            in_specs=[
                # Squeezed (None) batch dim -> kernel sees 2-D tiles.
                pl.BlockSpec((None, tm, tk), lambda b, m, n, k: (b, m, k)),
                # rhs block index ignores m -> reused across all m tiles.
                pl.BlockSpec((None, tk, tn), lambda b, m, n, k: (b, k, n)),
            ],
            out_specs=pl.BlockSpec((None, tm, tn), lambda b, m, n, k: (b, m, n)),
            scratch_shapes=[pltpu.VMEM((tm, tn), jnp.float32)],
        ),
        compiler_params=pltpu.CompilerParams(
            # b / m-tiles / n-tiles parallel (megacore sharding on v7x),
            # reduction axis k last and 'arbitrary'.
            dimension_semantics=("parallel", "parallel", "parallel", "arbitrary"),
        ),
        cost_estimate=pl.CostEstimate(
            flops=2 * B * AM * N * K,
            transcendentals=0,
            bytes_accessed=4 * (B * AM * K + B * K * N + B * AM * N),
        ),
    )(lhs_f, rhs)

    # Unfold A back out of M.
    return jnp.transpose(out_f.reshape(B, A, M, N), (1, 0, 2, 3))


# ---------------------------------------------------------------------------
# torch.matmul-style dispatcher (forward pass of MatmulDot)
# ---------------------------------------------------------------------------
def torch_matmul(lhs: jax.Array, rhs: jax.Array) -> jax.Array:
    if lhs.ndim == 1 and rhs.ndim == 1:
        return _dot1d(lhs, rhs)
    if lhs.ndim == 4 and rhs.ndim == 3:
        return _matmul_broadcast_batch_dim(lhs, rhs)
    # TODO(synk): other torch.matmul broadcasting ranks are not needed by this
    # test module and are not implemented here.
    raise NotImplementedError(f"unsupported ranks: {lhs.ndim}, {rhs.ndim}")


if __name__ == "__main__":
    key = jax.random.PRNGKey(0)
    k1, k2, k3, k4, k5, k6 = jax.random.split(key, 6)

    # --- MatmulDot spec case: two rank-1 f32 tensors -> scalar dot product. ---
    lhs_vec = jax.random.normal(k1, (3,), dtype=jnp.float32)
    rhs_vec = jax.random.normal(k2, (3,), dtype=jnp.float32)
    out_dot = jax.block_until_ready(torch_matmul(lhs_vec, rhs_vec))
    ref_dot = jnp.dot(lhs_vec, rhs_vec)
    assert out_dot.shape == ()
    assert jnp.allclose(out_dot, ref_dot, atol=1e-5, rtol=1e-5)

    # Slightly larger vector exercising the padded lane-dense path.
    lhs_vec2 = jax.random.normal(k3, (300,), dtype=jnp.float32)
    rhs_vec2 = jax.random.normal(k4, (300,), dtype=jnp.float32)
    out_dot2 = jax.block_until_ready(torch_matmul(lhs_vec2, rhs_vec2))
    assert jnp.allclose(out_dot2, jnp.dot(lhs_vec2, rhs_vec2), atol=1e-4, rtol=1e-5)

    # --- Broadcast-batched matmul path (the previously reviewed kernel). ---
    A, B, M, K, N = 4, 2, 8, 16, 8
    lhs4 = jax.random.normal(k5, (A, B, M, K), dtype=jnp.float32)
    rhs3 = jax.random.normal(k6, (B, K, N), dtype=jnp.float32)
    out4 = jax.block_until_ready(torch_matmul(lhs4, rhs3))
    ref4 = jnp.einsum("abmk,bkn->abmn", lhs4, rhs3)
    assert out4.shape == (A, B, M, N)
    assert jnp.allclose(out4, ref4, atol=1e-4, rtol=1e-5)

    print("KERNEL_OK")
</pallas_src>

<mosaic_0001>
module attributes {stable_mosaic.version = 11 : i64} {
  func.func @_dot_kernel(%arg0: memref<8x128xf32, #tpu.memory_space<vmem>>, %arg1: memref<8x128xf32, #tpu.memory_space<vmem>>, %arg2: memref<1x1xf32, #tpu.memory_space<smem>>) attributes {dimension_semantics = [], scalar_prefetch = 0 : i64, scratch_operands = 0 : i64, tpu.core_type = #tpu.core_type<tc>} {
    %c0 = arith.constant 0 : index
    %c0_0 = arith.constant 0 : index
    %0 = vector.load %arg0[%c0, %c0_0] : memref<8x128xf32, #tpu.memory_space<vmem>>, vector<8x128xf32>
    %c0_1 = arith.constant 0 : index
    %c0_2 = arith.constant 0 : index
    %1 = vector.load %arg1[%c0_1, %c0_2] : memref<8x128xf32, #tpu.memory_space<vmem>>, vector<8x128xf32>
    %2 = arith.mulf %0, %1 : vector<8x128xf32>
    %3 = vector.shape_cast %2 : vector<8x128xf32> to vector<1x8x128xf32>
    %cst = arith.constant dense<0.000000e+00> : vector<1xf32>
    %4 = vector.multi_reduction <add>, %3, %cst [1, 2] : vector<1x8x128xf32> to vector<1xf32>
    %5 = vector.shape_cast %4 : vector<1xf32> to vector<1x1x1xf32>
    %6 = vector.extract %5[0, 0, 0] : f32 from vector<1x1x1xf32>
    %c0_3 = arith.constant 0 : index
    %c0_4 = arith.constant 0 : index
    %7 = memref.load %arg2[%c0_3, %c0_4] : memref<1x1xf32, #tpu.memory_space<smem>>
    memref.store %6, %arg2[%c0_3, %c0_4] : memref<1x1xf32, #tpu.memory_space<smem>>
    return
  }
}

</mosaic_0001>

<bundles_post_ra>
// kernel: tpu_custom_call.1
= control target key start
LH: loop header
LB: loop body
LE: loop exit
PB: predicated region body
PF: predicated region fallthrough
CT: control target
= control target key end

     0   :  { %7 = vsyncpa [#allocation3], 0  ;;  %s151_s0 = inlined_call_operand.hbm [shape: f32[8,128], index: 0, kind: input, shape index: {}]   ;;  %s152_s1 = inlined_call_operand.hbm [shape: f32[8,128], index: 1, kind: input, shape index: {}]   ;;  %s153_s2 = inlined_call_operand.hbm [shape: f32[1,1], index: 2, kind: output, shape index: {}]  }
   0x1   :  { %8 = vsyncpa [#allocation6], 0 }
   0x2   :  { %9 = vsyncpa [#allocation4], 0  ;;  %s124_s9 = smov [#allocation2]   ;;  %s125_s11 = smov [#allocation5]  }
   0x3   :  { %s16_s10 = sshll.u32 %s124_s9, 4  ;;  %s26_s12 = sshll.u32 %s125_s11, 4  ;;  %s17_s10 = int_to_ptr.vmem [resolvable:$true] %s16_s10  ;;  %s27_s12 = int_to_ptr.vmem [resolvable:$true] %s26_s12 }
   0x4   :  { %s78_s13 = scalar_lea.vmem %s17_s10, 128  ;;  %p83_p1 = scmp.lt.s32.totalorder %s17_s10, %s17_s10 }
   0x5   :  { %p79_p0 = scmp.ne.s32.totalorder %s17_s10, %s78_s13  ;;  %p84_p2 = scmp.lt.s32.totalorder %s78_s13, %s78_s13 }
   0x7   :  { %p85_p3 = por %p84_p2, %p83_p1 }
   0x9   :  { %p86_p4 = pnand %p85_p3, %p79_p0 }
   0xb   :  { %89 = shalt.err (!%p86_p4)
}
   0xc   :  { %19 = dma.hbm_to_vmem [thread:$0]  %s151_s0, 128, %s17_s10, [#allocation3]  }
   0xd   :  { %s98_s16 = scalar_lea.vmem %s27_s12, 128  ;;  %p103_p6 = scmp.lt.s32.totalorder %s27_s12, %s27_s12 }
   0xe   :  { %p99_p5 = scmp.ne.s32.totalorder %s27_s12, %s98_s16  ;;  %p104_p7 = scmp.lt.s32.totalorder %s98_s16, %s98_s16 }
  0x10   :  { %p105_p8 = por %p104_p7, %p103_p6 }
  0x12   :  { %p106_p9 = pnand %p105_p8, %p99_p5 }
  0x14   :  { %109 = shalt.err (!%p106_p9)
}
  0x15   :  { %29 = dma.hbm_to_vmem [thread:$0]  %s152_s1, 128, %s27_s12, [#allocation6]  }
  0x16   :  { %118 = dma.done.wait [#allocation3], 128  }
  0x17   :  { %119 = vsyncadd [#allocation3], 4294967168 }
  0x18   :  { %120 = dma.done.wait [#allocation6], 128  }
  0x19   :  { %121 = vsyncadd [#allocation6], 4294967168  ;;  %v36_v0 = vld [vmem:[#allocation2] sm:$0xff]  ;;  %v37_v1 = vld [vmem:[#allocation5] sm:$0xff]  ;;  %s126_s19 = smov [#allocation7]  }
  0x1a   :  { %v38_v2 = vmul.f32 %v37_v1, %v36_v0 }
  0x1c   :  { %39 = vadd.xlane.f32.xlu0 %v38_v2 }
  0xa5   :  { %v40_v3 = vpop.xlane.xlu0 %39 }
  0xa6   :  { %v41_v4 = vrot.slane %v40_v3, 4 }
  0xa8   :  { %v42_v5 = vadd.f32 %v41_v4, %v40_v3 }
  0xaa   :  { %v43_v6 = vrot.slane %v42_v5, 2 }
  0xac   :  { %v44_v7 = vadd.f32 %v43_v6, %v42_v5 }
  0xae   :  { %v45_v8 = vrot.slane %v44_v7, 1 }
  0xb0   :  { %v46_v9 = vadd.f32 %v45_v8, %v44_v7 }
  0xb2   :  { %65 = vpush %v46_v9 }
  0xe3   :  { %s66_s0 = spop %65 }
  0xe4   :  { %49 = sst [smem:[#allocation7]] %s66_s0 }
  0xe5   :  { %57 = dma.smem_to_hbm %s126_s19, 16, %s153_s2, [#allocation4]  }
  0xe6   :  { %122 = dma.done.wait [#allocation4], 16  }
  0xe7   :  { %123 = vsyncadd [#allocation4], 4294967280 }
  0xe8   :  { %61 = sfence }
  0xe9   :  { %62 = vsyncpa [#allocation3], 1 }
  0xea   :  { %63 = vsyncpa [#allocation6], 1 }
  0xeb   :  { %64 = vsyncpa [#allocation4], 1 }

</bundles_post_ra>
